<compile_context>
chip_gen: v5e
topology: v5e:2x2
jax: 0.10.0
libtpu: 0.0.40
codegen_flags: <defaults>
</compile_context>

<pallas_src>
import jax
import jax.numpy as jnp
from jax.experimental import pallas as pl
from jax.experimental.pallas import tpu as pltpu


def _round_up(x, m):
    return ((x + m - 1) // m) * m


# ---------------------------------------------------------------------------
# Pallas kernel 1: tiled matmul (feature projection, stand-in for CLIP towers)
# ---------------------------------------------------------------------------
def _matmul_kernel(x_ref, w_ref, o_ref):
    # f32 accumulation directly into the K-resident output block.
    @pl.when(pl.program_id(2) == 0)
    def _():
        o_ref[...] = jnp.zeros_like(o_ref)

    # Operands arrive pre-cast to bf16 from the wrapper; MXU matmul, f32 acc.
    o_ref[...] += jnp.dot(x_ref[...], w_ref[...],
                          preferred_element_type=jnp.float32)


def linear_proj(x, w, *, tm=256, tn=256, tk=512):
    """x: (M, K), w: (K, N) -> (M, N) f32 via a tiled Pallas matmul.

    bf16 operand streaming (cast once here, not per block), zero-padding of
    non-divisible dims to tile multiples (bounded block sizes on every gen),
    parallel M/N grid axes + trailing 'arbitrary' K reduction axis.
    """
    M, K = x.shape
    K2, N = w.shape
    assert K == K2
    x = x.astype(jnp.bfloat16)
    w = w.astype(jnp.bfloat16)
    tm = min(tm, _round_up(M, 16))     # sublane axis (16 = bf16 packing unit)
    tn = min(tn, _round_up(N, 128))    # lane axis
    tk = min(tk, _round_up(K, 128))
    Mp, Kp, Np = _round_up(M, tm), _round_up(K, tk), _round_up(N, tn)
    if (Mp, Kp) != (M, K):
        x = jnp.pad(x, ((0, Mp - M), (0, Kp - K)))
    if (Kp, Np) != (K, N):
        w = jnp.pad(w, ((0, Kp - K), (0, Np - N)))
    out = pl.pallas_call(
        _matmul_kernel,
        out_shape=jax.ShapeDtypeStruct((Mp, Np), jnp.float32),
        grid=(Mp // tm, Np // tn, Kp // tk),
        in_specs=[
            pl.BlockSpec((tm, tk), lambda i, j, k: (i, k)),
            pl.BlockSpec((tk, tn), lambda i, j, k: (k, j)),
        ],
        out_specs=pl.BlockSpec((tm, tn), lambda i, j, k: (i, j)),
        compiler_params=pltpu.CompilerParams(
            dimension_semantics=("parallel", "parallel", "arbitrary"),
            vmem_limit_bytes=32 * 1024 * 1024),
    )(x, w)
    return out[:M, :N]


# ---------------------------------------------------------------------------
# Pallas kernel 2: similarity logits (sims_tf, sims_tc, sims_cf)
# ---------------------------------------------------------------------------
def _topk_sum(s, k):
    """s: (Bt, N, Ap) f32 -> (Bt, Ap): per (b, a) column, sum of the k largest
    entries along axis 1.  k knock-out iterations (no sort ops in Mosaic);
    ties are knocked out together — exact duplicates are measure-zero for
    f32 similarities (matches torch.topk for distinct values)."""
    def body(_, carry):
        acc, cur = carry
        m = jnp.max(cur, axis=1, keepdims=True)      # (Bt, 1, Ap)
        acc = acc + m[:, 0, :]
        cur = jnp.where(cur == m, -jnp.inf, cur)
        return acc, cur

    acc0 = jnp.zeros((s.shape[0], s.shape[2]), jnp.float32)
    acc, _ = jax.lax.fori_loop(0, k, body, (acc0, s), unroll=True)
    return acc


def _sims_kernel(t_ref, f_ref, c_ref, scf_ref, mcf_ref, tf_ref, tc_ref, cf_ref):
    # Per grid step (a block of Bt videos):
    #   t_ref   : (Dp, Ap)      pre-transposed bf16 caption features (all a)
    #   f_ref   : (Bt, F, Dp)   bf16 frame features
    #   c_ref   : (Bt, C, Dp)   bf16 seq-caption features
    #   scf_ref : (Bt, C*F, Ap) f32 c@f similarity slab (computed once in JAX)
    #   mcf_ref : (Bt, C*F, Ap) bf16 DTW path mask (same layout)
    #   outputs : (Bt, Ap)      rows b of sims^T (lane-dense store)
    Bt, F, Dp = f_ref.shape
    C = c_ref.shape[1]
    Ap = t_ref.shape[1]
    t = t_ref[...]                                           # (Dp, Ap) bf16
    # One (Bt*F, Dp) @ (Dp, Ap) MXU matmul per block instead of Bt tiny ones.
    s_tf = jnp.dot(f_ref[...].reshape(Bt * F, Dp), t,
                   preferred_element_type=jnp.float32).reshape(Bt, F, Ap)
    s_tc = jnp.dot(c_ref[...].reshape(Bt * C, Dp), t,
                   preferred_element_type=jnp.float32).reshape(Bt, C, Ap)
    tf_ref[...] = _topk_sum(s_tf, F // 2)
    tc_ref[...] = _topk_sum(s_tc, C // 2)
    # Fused masked reduction for sims_cf (mask streamed as bf16, exact 0/1).
    cf_ref[...] = jnp.sum(scf_ref[...] * mcf_ref[...].astype(jnp.float32), axis=1)


def _pick_bt(B, F):
    """Largest divisor of B with Bt*F <= 256 MXU rows while keeping the grid
    length >= 2 (so v7x's two TensorCores both get work)."""
    bt = 1
    for cand in range(1, B + 1):
        if B % cand == 0 and cand * F <= 256 and B // cand >= 2:
            bt = cand
    return bt


def sims_pallas(t_n, f_n, c_n, s_cf, mask_cf):
    """t_n: (A, Dp), f_n: (B, F, Dp), c_n: (B, C, Dp),
    s_cf / mask_cf: (B, C, F, A) (already in the kernel's layout).
    Returns (sims_tf, sims_tc, sims_cf), each (A, B) f32."""
    A, Dp = t_n.shape
    B, F, _ = f_n.shape
    C = c_n.shape[1]
    Ap = _round_up(A, 128)          # lane-dense caption axis
    Bt = _pick_bt(B, F)
    nb = B // Bt

    # Pre-transpose t once in the wrapper: clean (Dp, Ap) MXU feed, no per-step
    # in-kernel XLU transpose.  bf16 operands halve the t/f/c DMA bytes.
    t_t = jnp.pad(t_n, ((0, Ap - A), (0, 0))).T.astype(jnp.bfloat16)
    f_b = f_n.astype(jnp.bfloat16)
    c_b = c_n.astype(jnp.bfloat16)
    # (B, C, F, A) -> (B, C*F, Ap): contiguous reshape (free view); the A-pad
    # is a no-op whenever the caption batch is already a multiple of 128.
    s2 = jnp.pad(s_cf, ((0, 0), (0, 0), (0, 0), (0, Ap - A))).reshape(B, C * F, Ap)
    m2 = jnp.pad(mask_cf, ((0, 0), (0, 0), (0, 0), (0, Ap - A))) \
            .reshape(B, C * F, Ap).astype(jnp.bfloat16)

    out_sds = jax.ShapeDtypeStruct((nb, Bt, Ap), jnp.float32)
    outs = pl.pallas_call(
        _sims_kernel,
        out_shape=(out_sds, out_sds, out_sds),
        grid=(nb,),
        in_specs=[
            pl.BlockSpec((Dp, Ap), lambda b: (0, 0)),
            pl.BlockSpec((Bt, F, Dp), lambda b: (b, 0, 0)),
            pl.BlockSpec((Bt, C, Dp), lambda b: (b, 0, 0)),
            pl.BlockSpec((Bt, C * F, Ap), lambda b: (b, 0, 0)),
            pl.BlockSpec((Bt, C * F, Ap), lambda b: (b, 0, 0)),
        ],
        out_specs=(
            pl.BlockSpec((None, Bt, Ap), lambda b: (b, 0, 0)),
            pl.BlockSpec((None, Bt, Ap), lambda b: (b, 0, 0)),
            pl.BlockSpec((None, Bt, Ap), lambda b: (b, 0, 0)),
        ),
        compiler_params=pltpu.CompilerParams(
            dimension_semantics=("parallel",),
            vmem_limit_bytes=32 * 1024 * 1024),
    )(t_t, f_b, c_b, s2, m2)
    # (nb, Bt, Ap) -> (B, Ap) -> slice the real captions -> (A, B)
    return tuple(o.reshape(B, Ap)[:, :A].T for o in outs)


# ---------------------------------------------------------------------------
# Helpers (plain JAX glue)
# ---------------------------------------------------------------------------
def _l2_normalize(x, eps=1e-12):
    return x * jax.lax.rsqrt(jnp.sum(x * x, axis=-1, keepdims=True) + eps)


def _pad_cols(w, mult=128):
    """Zero-pad the embedding dim to a lane-dense multiple of 128.
    Zero columns change neither norms nor dot products downstream."""
    _, d = w.shape
    d_pad = _round_up(d, mult)
    if d_pad == d:
        return w
    return jnp.pad(w, ((0, 0), (0, d_pad - d)))


# TODO(synk): fast_dtw() is not defined in the provided source; assumed to be
# a hard DTW alignment-path binary mask maximizing cumulative similarity
# (diag >= up >= left tie preference).
def _dtw_path_mask(S):
    """S: (C, F) f32 similarity -> (C, F) binary mask of the max-cumulative
    DTW alignment path.  Forward DP + backtrack via lax.scan (vectorizes
    cleanly under vmap, fast to compile)."""
    C, F = S.shape
    neg = jnp.float32(-jnp.inf)

    # --- forward DP: row scan with an inner prefix scan over columns -------
    def row_step(prev_row, s_row):
        diag = jnp.concatenate([jnp.full((1,), neg), prev_row[:-1]])

        def col_step(left, xs):
            s, up_j, diag_j = xs
            best = jnp.maximum(diag_j, jnp.maximum(up_j, left))
            best = jnp.where(best == neg, jnp.float32(0.0), best)  # (0,0) start
            val = s + best
            return val, val

        _, row = jax.lax.scan(col_step, neg, (s_row, prev_row, diag))
        return row, row

    _, Dmat = jax.lax.scan(row_step, jnp.full((F,), neg), S)        # (C, F)

    # --- backtrack from (C-1, F-1); path length <= C+F-1 -------------------
    def back_step(carry, _):
        i, j, mask = carry
        mask = mask.at[i, j].set(1.0)
        at0 = (i == 0) & (j == 0)
        im1 = jnp.maximum(i - 1, 0)
        jm1 = jnp.maximum(j - 1, 0)
        d_diag = jnp.where((i > 0) & (j > 0), Dmat[im1, jm1], neg)
        d_up = jnp.where(i > 0, Dmat[im1, j], neg)
        d_left = jnp.where(j > 0, Dmat[i, jm1], neg)
        go_diag = (i > 0) & (j > 0) & (d_diag >= d_up) & (d_diag >= d_left)
        go_up = (i > 0) & jnp.logical_not(go_diag) & (d_up >= d_left)
        ni = jnp.where(at0, i, jnp.where(go_diag | go_up, i - 1, i))
        nj = jnp.where(at0, j, jnp.where(go_up, j, j - 1))
        return (ni, nj, mask), None

    init = (jnp.int32(C - 1), jnp.int32(F - 1), jnp.zeros((C, F), jnp.float32))
    (_, _, mask), _ = jax.lax.scan(back_step, init, None, length=C + F - 1)
    return mask


# ---------------------------------------------------------------------------
# Full forward (train branch of CLIPStochastic.forward)
# ---------------------------------------------------------------------------
def clip_features(video, cap, seq_cap, w_img, w_txt):
    """CLIP tower stand-ins: linear projections batched into two Pallas
    matmuls (all B*F frames; cap + all C seq-captions in one launch)."""
    B, F = video.shape[0], video.shape[1]
    C = seq_cap.shape[0]
    w_img_p = _pad_cols(w_img)
    w_txt_p = _pad_cols(w_txt)
    Dp = w_img_p.shape[1]

    frames = video.reshape(B * F, -1)                          # (B*F, 3*R*R)
    f_feats = linear_proj(frames, w_img_p).reshape(B, F, Dp)

    txt_in = jnp.concatenate([cap, seq_cap.reshape(C * B, -1)], axis=0)
    txt_out = linear_proj(txt_in, w_txt_p)                     # ((1+C)*B, Dp)
    t_feats = txt_out[:B]
    c_feats = txt_out[B:].reshape(C, B, Dp).transpose(1, 0, 2)  # (B, C, Dp)

    # The original re-normalizes already-unit vectors; once is equivalent.
    return _l2_normalize(t_feats), _l2_normalize(f_feats), _l2_normalize(c_feats)


def sims_from_features(t_n, f_n, c_n):
    # c@f similarity emitted once, directly in the kernel's (b, c, f, a)
    # layout (no transpose copies); reused for the DTW mask and sims_cf.
    s_cf = jnp.einsum('acd,bfd->bcfa', c_n, f_n)               # (B, C, F, A)
    mask_cf = jax.vmap(jax.vmap(_dtw_path_mask, in_axes=-1, out_axes=-1))(s_cf)
    return sims_pallas(t_n, f_n, c_n, s_cf, mask_cf)


def clip_stochastic_forward(video, cap, seq_cap, w_img, w_txt):
    """Train branch of CLIPStochastic.forward -> (sims_tf, sims_tc, sims_cf)."""
    return sims_from_features(*clip_features(video, cap, seq_cap, w_img, w_txt))


def _reference_sims(t_n, f_n, c_n):
    """Pure-JAX reference of the similarity-logits stage (correctness check)."""
    F = f_n.shape[1]
    C = c_n.shape[1]
    s_tf = jnp.einsum('ad,bfd->abf', t_n, f_n)
    sims_tf = jax.lax.top_k(s_tf, F // 2)[0].sum(-1)
    s_tc = jnp.einsum('ad,bcd->abc', t_n, c_n)
    sims_tc = jax.lax.top_k(s_tc, C // 2)[0].sum(-1)
    s_cf = jnp.einsum('acd,bfd->bcfa', c_n, f_n)
    mask = jax.vmap(jax.vmap(_dtw_path_mask, in_axes=-1, out_axes=-1))(s_cf)
    sims_cf = jnp.einsum('bcfa,bcfa->ab', s_cf, mask)
    return sims_tf, sims_tc, sims_cf


if __name__ == "__main__":
    B = 2          # batch (also the caption count A)
    F = 8          # num_frames
    C = F // 2     # number of seq captions
    R = 16         # input_res
    D = 32         # embed_dim
    TXT = 64       # synthetic text feature width

    key = jax.random.PRNGKey(0)
    k1, k2, k3, k4, k5 = jax.random.split(key, 5)
    video = jax.random.normal(k1, (B, F, 3, R, R), jnp.float32)
    cap = jax.random.normal(k2, (B, TXT), jnp.float32)
    seq_cap = jax.random.normal(k3, (C, B, TXT), jnp.float32)
    w_img = jax.random.normal(k4, (3 * R * R, D), jnp.float32) / jnp.sqrt(3.0 * R * R)
    w_txt = jax.random.normal(k5, (TXT, D), jnp.float32) / jnp.sqrt(1.0 * TXT)

    # Full forward = clip_features (Pallas matmul towers) -> sims_from_features
    # (DTW mask + Pallas sims kernel).  Split at a device boundary so the same
    # features feed both the Pallas kernels and the pure-JAX reference check.
    t_n, f_n, c_n = jax.block_until_ready(
        jax.jit(clip_features)(video, cap, seq_cap, w_img, w_txt))
    sims_tf, sims_tc, sims_cf = jax.block_until_ready(
        jax.jit(sims_from_features)(t_n, f_n, c_n))

    assert sims_tf.shape == (B, B) and sims_tc.shape == (B, B) and sims_cf.shape == (B, B)

    # Correctness check against the plain-JAX reference (bf16 kernel operands
    # with f32 accumulation -> loose tolerance).
    r_tf, r_tc, r_cf = jax.block_until_ready(
        jax.jit(_reference_sims)(t_n, f_n, c_n))
    for got, ref in ((sims_tf, r_tf), (sims_tc, r_tc), (sims_cf, r_cf)):
        assert bool(jnp.all(jnp.isfinite(got)))
        assert bool(jnp.max(jnp.abs(got - ref)) < 5e-2)

    print("KERNEL_OK")
</pallas_src>

<mosaic_0001>
module attributes {stable_mosaic.version = 11 : i64} {
  func.func @_matmul_kernel(%arg0: i32, %arg1: i32, %arg2: i32, %arg3: memref<16x128xbf16, #tpu.memory_space<vmem>>, %arg4: memref<128x128xbf16, #tpu.memory_space<vmem>>, %arg5: memref<16x128xf32, #tpu.memory_space<vmem>>) attributes {dimension_semantics = [#tpu.dimension_semantics<parallel>, #tpu.dimension_semantics<parallel>, #tpu.dimension_semantics<arbitrary>], iteration_bounds = array<i64: 1, 1, 1>, scalar_prefetch = 0 : i64, scratch_operands = 0 : i64, tpu.core_type = #tpu.core_type<tc>, window_params = [{transform_indices = @transform_0, window_bounds = array<i64: 16, 128>}, {transform_indices = @transform_1, window_bounds = array<i64: 128, 128>}, {transform_indices = @transform_2, window_bounds = array<i64: 16, 128>}]} {
    %c0_i32 = arith.constant 0 : i32
    %0 = arith.cmpi eq, %arg2, %c0_i32 : i32
    %1 = arith.extui %0 : i1 to i32
    %c0_i32_0 = arith.constant 0 : i32
    %2 = arith.cmpi ne, %1, %c0_i32_0 : i32
    scf.if %2 {
      %cst_8 = arith.constant 0.000000e+00 : f32
      %9 = vector.broadcast %cst_8 : f32 to vector<16x128xf32>
      %c0_9 = arith.constant 0 : index
      %c0_10 = arith.constant 0 : index
      %10 = vector.load %arg5[%c0_9, %c0_10] : memref<16x128xf32, #tpu.memory_space<vmem>>, vector<16x128xf32>
      tpu.vector_store %arg5[%c0_9, %c0_10], %9 {strides = array<i32>} : memref<16x128xf32, #tpu.memory_space<vmem>>, vector<16x128xf32>,
    } else {
    }
    %c0 = arith.constant 0 : index
    %c0_1 = arith.constant 0 : index
    %3 = vector.load %arg5[%c0, %c0_1] : memref<16x128xf32, #tpu.memory_space<vmem>>, vector<16x128xf32>
    %c0_2 = arith.constant 0 : index
    %c0_3 = arith.constant 0 : index
    %4 = vector.load %arg3[%c0_2, %c0_3] : memref<16x128xbf16, #tpu.memory_space<vmem>>, vector<16x128xbf16>
    %c0_4 = arith.constant 0 : index
    %c0_5 = arith.constant 0 : index
    %5 = vector.load %arg4[%c0_4, %c0_5] : memref<128x128xbf16, #tpu.memory_space<vmem>>, vector<128x128xbf16>
    %cst = arith.constant dense<0.000000e+00> : vector<16x128xf32>
    %6 = tpu.matmul %4, %5, %cst {dimension_numbers = #tpu.dot_dimension_numbers<[1], [0], [0], [1], [0, 0, 1, 1], [], []>} : vector<16x128xbf16>, vector<128x128xbf16>, vector<16x128xf32> -> vector<16x128xf32>
    %7 = arith.addf %3, %6 : vector<16x128xf32>
    %c0_6 = arith.constant 0 : index
    %c0_7 = arith.constant 0 : index
    %8 = vector.load %arg5[%c0_6, %c0_7] : memref<16x128xf32, #tpu.memory_space<vmem>>, vector<16x128xf32>
    tpu.vector_store %arg5[%c0_6, %c0_7], %7 {strides = array<i32>} : memref<16x128xf32, #tpu.memory_space<vmem>>, vector<16x128xf32>,
    return
  }
  func.func @transform_0(%arg0: i32, %arg1: i32, %arg2: i32) -> (i32, i32) {
    %c0_i32 = arith.constant 0 : i32
    return %arg0, %arg2 : i32, i32
  }
  func.func @transform_1(%arg0: i32, %arg1: i32, %arg2: i32) -> (i32, i32) {
    %c0_i32 = arith.constant 0 : i32
    return %arg2, %arg1 : i32, i32
  }
  func.func @transform_2(%arg0: i32, %arg1: i32, %arg2: i32) -> (i32, i32) {
    %c0_i32 = arith.constant 0 : i32
    return %arg0, %arg1 : i32, i32
  }
}

module attributes {stable_mosaic.version = 11 : i64} {
  func.func @_matmul_kernel(%arg0: i32, %arg1: i32, %arg2: i32, %arg3: memref<16x512xbf16, #tpu.memory_space<vmem>>, %arg4: memref<512x128xbf16, #tpu.memory_space<vmem>>, %arg5: memref<16x128xf32, #tpu.memory_space<vmem>>) attributes {dimension_semantics = [#tpu.dimension_semantics<parallel>, #tpu.dimension_semantics<parallel>, #tpu.dimension_semantics<arbitrary>], iteration_bounds = array<i64: 1, 1, 2>, scalar_prefetch = 0 : i64, scratch_operands = 0 : i64, tpu.core_type = #tpu.core_type<tc>, window_params = [{transform_indices = @transform_0, window_bounds = array<i64: 16, 512>}, {transform_indices = @transform_1, window_bounds = array<i64: 512, 128>}, {transform_indices = @transform_2, window_bounds = array<i64: 16, 128>}]} {
    %c0_i32 = arith.constant 0 : i32
    %0 = arith.cmpi eq, %arg2, %c0_i32 : i32
    %1 = arith.extui %0 : i1 to i32
    %c0_i32_0 = arith.constant 0 : i32
    %2 = arith.cmpi ne, %1, %c0_i32_0 : i32
    scf.if %2 {
      %cst_8 = arith.constant 0.000000e+00 : f32
      %9 = vector.broadcast %cst_8 : f32 to vector<16x128xf32>
      %c0_9 = arith.constant 0 : index
      %c0_10 = arith.constant 0 : index
      %10 = vector.load %arg5[%c0_9, %c0_10] : memref<16x128xf32, #tpu.memory_space<vmem>>, vector<16x128xf32>
      tpu.vector_store %arg5[%c0_9, %c0_10], %9 {strides = array<i32>} : memref<16x128xf32, #tpu.memory_space<vmem>>, vector<16x128xf32>,
    } else {
    }
    %c0 = arith.constant 0 : index
    %c0_1 = arith.constant 0 : index
    %3 = vector.load %arg5[%c0, %c0_1] : memref<16x128xf32, #tpu.memory_space<vmem>>, vector<16x128xf32>
    %c0_2 = arith.constant 0 : index
    %c0_3 = arith.constant 0 : index
    %4 = vector.load %arg3[%c0_2, %c0_3] : memref<16x512xbf16, #tpu.memory_space<vmem>>, vector<16x512xbf16>
    %c0_4 = arith.constant 0 : index
    %c0_5 = arith.constant 0 : index
    %5 = vector.load %arg4[%c0_4, %c0_5] : memref<512x128xbf16, #tpu.memory_space<vmem>>, vector<512x128xbf16>
    %cst = arith.constant dense<0.000000e+00> : vector<16x128xf32>
    %6 = tpu.matmul %4, %5, %cst {dimension_numbers = #tpu.dot_dimension_numbers<[1], [0], [0], [1], [0, 0, 1, 1], [], []>} : vector<16x512xbf16>, vector<512x128xbf16>, vector<16x128xf32> -> vector<16x128xf32>
    %7 = arith.addf %3, %6 : vector<16x128xf32>
    %c0_6 = arith.constant 0 : index
    %c0_7 = arith.constant 0 : index
    %8 = vector.load %arg5[%c0_6, %c0_7] : memref<16x128xf32, #tpu.memory_space<vmem>>, vector<16x128xf32>
    tpu.vector_store %arg5[%c0_6, %c0_7], %7 {strides = array<i32>} : memref<16x128xf32, #tpu.memory_space<vmem>>, vector<16x128xf32>,
    return
  }
  func.func @transform_0(%arg0: i32, %arg1: i32, %arg2: i32) -> (i32, i32) {
    %c0_i32 = arith.constant 0 : i32
    return %arg0, %arg2 : i32, i32
  }
  func.func @transform_1(%arg0: i32, %arg1: i32, %arg2: i32) -> (i32, i32) {
    %c0_i32 = arith.constant 0 : i32
    return %arg2, %arg1 : i32, i32
  }
  func.func @transform_2(%arg0: i32, %arg1: i32, %arg2: i32) -> (i32, i32) {
    %c0_i32 = arith.constant 0 : i32
    return %arg0, %arg1 : i32, i32
  }
}

</mosaic_0001>

<bundles_post_ra>
// kernel: clip_features.3
= control target key start
LH: loop header
LB: loop body
LE: loop exit
PB: predicated region body
PF: predicated region fallthrough
CT: control target
= control target key end

     0   :  { %s207_s1 = inlined_call_operand.vmem [shape: bf16[128,128], index: 1, kind: input, shape index: {}]   ;;  %s208_s0 = inlined_call_operand.vmem [shape: bf16[16,128], index: 0, kind: input, shape index: {}]   ;;  %s209_s2 = inlined_call_operand.vmem [shape: f32[16,128], index: 2, kind: output, shape index: {}]  }
   0x1   :  { %v157_v0 = vld [vmem:[%s207_s1 + $0x38] sm:$0xff]  ;;  %v156_v1 = vld [vmem:[%s207_s1 + $0x30] sm:$0xff]  ;;  %v155_v2 = vld [vmem:[%s207_s1 + $0x28] sm:$0xff] }
   0x2   :  { %91 = vmatpush.bf16.msra.mxu0 %v157_v0  ;;  %v154_v3 = vld [vmem:[%s207_s1 + $0x20] sm:$0xff]  ;;  %v153_v4 = vld [vmem:[%s207_s1 + $0x18] sm:$0xff]  ;;  %v152_v5 = vld [vmem:[%s207_s1 + $0x10] sm:$0xff] }
   0x3   :  { %v151_v6 = vld [vmem:[%s207_s1 + $0x8] sm:$0xff]  ;;  %v150_v7 = vld [vmem:[%s207_s1] sm:$0xff] }
   0x4   :  { %v149_v8 = vld [vmem:[%s208_s0] sm:$0xff] }
   0x6   :  { %92 = vmatpush.bf16.msra.mxu0 %v156_v1 }
   0xa   :  { %93 = vmatpush.bf16.msra.mxu0 %v155_v2 }
   0xe   :  { %94 = vmatpush.bf16.msra.mxu0 %v154_v3 }
  0x12   :  { %95 = vmatpush.bf16.msra.mxu0 %v153_v4 }
  0x16   :  { %96 = vmatpush.bf16.msra.mxu0 %v152_v5 }
  0x1a   :  { %97 = vmatpush.bf16.msra.mxu0 %v151_v6 }
  0x1e   :  { %98 = vmatpush.bf16.msra.mxu0 %v150_v7 }
  0x21   :  { %99 = vmatmul.bf16.vlgmr.msra.gmra.mxu0 %v149_v8 }
  0x9e   :  { %v100_v9 = vpop.f32.mrf.mxu0 }
  0x9f   :  { %107 = vst [vmem:[%s209_s2] sm:$0xff] %v100_v9 }
  0xa6   :  { %v102_v10 = vpop.f32.mrf.mxu0 }
  0xa7   :  { %108 = vst [vmem:[%s209_s2 + $0x8] sm:$0xff] %v102_v10 }

// kernel: clip_features.2
= control target key start
LH: loop header
LB: loop body
LE: loop exit
PB: predicated region body
PF: predicated region fallthrough
CT: control target
= control target key end

     0   :  { %s978_s9 = smov 0   ;;  %s980_s10 = smov 0   ;;  %s1106_s0 = inlined_call_operand.vmem [shape: bf16[16,1024], index: 0, kind: input, shape index: {}]   ;;  %s1107_s1 = inlined_call_operand.vmem [shape: bf16[1024,128], index: 1, kind: input, shape index: {}]   ;;  %s1108_s2 = inlined_call_operand.vmem [shape: f32[16,128], index: 2, kind: output, shape index: {}]  }
   0x1   :  { %s982_s11 = smov 0   ;;  %s984_s12 = smov 0  }
   0x2   :  { %s986_s13 = smov 0  }
   0x3 LB: > { %s24_s14 = sadd.s32 1, %s956_s12  ;;  %p47_p1 = scmp.ne.s32.totalorder %s948_s10, %s944_s9  ;;  %s960_s13 = sphi %s986_s13, %s12_s13   ;;  %s956_s12 = sphi %s984_s12, %s1112_s12   ;;  %s952_s11 = sphi %s982_s11, %s1111_s11   ;;  %s948_s10 = sphi %s980_s10, %s1110_s10   ;;  %s944_s9 = sphi %s978_s9, %s1109_s9  }
   0x4   : > { %p25_p0 = scmp.ge.s32.totalorder %s24_s14, 2  ;;  %p48_p2 = scmp.eq.s32.totalorder %s960_s13, 0 }
   0x5   : > { %s40_s16 = sadd.s32 1, %s948_s10  ;;  %p687_p5 = scmp.ge.s32.totalorder %s960_s13, 2 }
   0x6   : > { %s1114_s14 = smov (%p25_p0, %s24_s14), 0  ;;  %p49_p3 = por %p48_p2, %p47_p1 }
   0x7   : > { %s36_s15 = ssub.s32 %s956_s12, %s1114_s14  ;;  %129 = sbr.rel (%p687_p5) target bundleno = 20 (0x14), region = 16 }
   0x8   : > { %p38_p4 = scmp.eq.s32.totalorder %s36_s15, 0 }
   0xa   : > { %s1013_s17 = scalar_select %p38_p4, %s948_s10, %s40_s16  }
   0xc   : > { %132 = sbr.rel (!%p49_p3) target bundleno = 20 (0x14), region = 20  ;;  %s134_s18 = sand.u32 (%p49_p3), 1, %s948_s10  }
   0xd   : > { %s844_s19 = sshll.u32 (%p49_p3), %s956_s12, 4  ;;  %s688_s20 = sshll.u32 (%p49_p3), %s134_s18, 5 }
   0xe   : > { %s142_s23 = scalar_lea.vmem (%p49_p3), %s1106_s0, %s844_s19  ;;  %s136_s24 = scalar_lea.vmem (%p49_p3), [#allocation2], %s688_s20 }
   0xf   : > { %v155_v0 = vld [vmem:[%s142_s23] sm:$0xff] (%p49_p3)  ;;  %v157_v1 = vld [vmem:[%s142_s23 + $0x8] sm:$0xff] (%p49_p3) }
  0x10   : > { %v159_v2 = vld [vmem:[%s142_s23 + $0x20] sm:$0xff] (%p49_p3)  ;;  %156 = vst [vmem:[%s136_s24] sm:$0xff] (%p49_p3), %v155_v0  ;;  %v161_v3 = vld [vmem:[%s142_s23 + $0x28] sm:$0xff] (%p49_p3) }
  0x11   : > { %158 = vst [vmem:[%s136_s24 + $0x8] sm:$0xff] %v157_v1 }
  0x12   : > { %160 = vst [vmem:[%s136_s24 + $0x10] sm:$0xff] %v159_v2 }
  0x13   : > { %162 = vst [vmem:[%s136_s24 + $0x18] sm:$0xff] %v161_v3 }
  0x14 PF: > { %p691_p6 = scmp.ge.s32.totalorder %s960_s13, 1  ;;  %p179_p7 = scmp.lt.s32.totalorder %s960_s13, 3 }
  0x16   : > { %p180_p8 = pnand %p691_p6, %p179_p7 }
  0x17   : > { %s186_s25 = sand.u32 (!%p180_p8), 1, %s944_s9   ;;  %s693_s26 = sshll.u32 (!%p180_p8), %s952_s11, 6 }
  0x18   : > { %183 = sbr.rel (%p180_p8) target bundleno = 218 (0xda), region = 47  ;;  %s692_s27 = sshll.u32 (!%p180_p8), %s186_s25, 5 }
  0x19   : > { %p221_p9 = scmp.lt.s32.totalorder (!%p180_p8), %s693_s26, 127  ;;  %s1030_s4 = scalar_lea.vmem (!%p180_p8), [#allocation2], %s692_s27 }
  0x1a   : > { %p695_p10 = scmp.ne.s32.totalorder (!%p180_p8), %s952_s11, 0 }
  0x1d   : > { %s1116_s26 = smov (!%p221_p9, %s693_s26), 127  ;;  %241 = sbr.rel (%p695_p10) target bundleno = 37 (0x25), region = 55 }
  0x1e   : > { %s694_s28 = sshll.u32 %s1116_s26, 2 }
  0x1f   : > { %s1028_s3 = scalar_lea.vmem %s1107_s1, %s694_s28 }
  0x22   : > { %v962_v4 = vmov 0.0  }
  0x23   : > { %242 = vst [vmem:[%s1108_s2] sm:$0xff] %v962_v4 }
  0x24   : > { %243 = vst [vmem:[%s1108_s2 + $0x8] sm:$0xff] %v962_v4 }
  0x25 PF: > { %v856_v5 = vld [vmem:[%s1028_s3 + $0x38] sm:$0xff]  ;;  %v855_v9 = vld [vmem:[%s1028_s3 + $0x30] sm:$0xff]  ;;  %v854_v13 = vld [vmem:[%s1028_s3 + $0x28] sm:$0xff] }
  0x26   : > { %v864_v6 = vld [vmem:[%s1028_s3 + $0x78] sm:$0xff]  ;;  %526 = vmatpush.bf16.msra.mxu0 %v856_v5  ;;  %v863_v10 = vld [vmem:[%s1028_s3 + $0x70] sm:$0xff]  ;;  %v862_v14 = vld [vmem:[%s1028_s3 + $0x68] sm:$0xff] }
  0x27   : > { %v872_v7 = vld [vmem:[%s1028_s3 + $0xb8] sm:$0xff]  ;;  %540 = vmatpush.bf16.msra.mxu1 %v864_v6  ;;  %v871_v11 = vld [vmem:[%s1028_s3 + $0xb0] sm:$0xff]  ;;  %v870_v15 = vld [vmem:[%s1028_s3 + $0xa8] sm:$0xff] }
  0x28   : > { %v880_v8 = vld [vmem:[%s1028_s3 + $0xf8] sm:$0xff]  ;;  %554 = vmatpush.bf16.msra.mxu2 %v872_v7  ;;  %v879_v12 = vld [vmem:[%s1028_s3 + $0xf0] sm:$0xff]  ;;  %v878_v16 = vld [vmem:[%s1028_s3 + $0xe8] sm:$0xff] }
  0x29   : > { %568 = vmatpush.bf16.msra.mxu3 %v880_v8  ;;  %v853_v17 = vld [vmem:[%s1028_s3 + $0x20] sm:$0xff]  ;;  %v852_v21 = vld [vmem:[%s1028_s3 + $0x18] sm:$0xff]  ;;  %v851_v25 = vld [vmem:[%s1028_s3 + $0x10] sm:$0xff] }
  0x2a   : > { %527 = vmatpush.bf16.msra.mxu0 %v855_v9  ;;  %v861_v18 = vld [vmem:[%s1028_s3 + $0x60] sm:$0xff]  ;;  %v860_v22 = vld [vmem:[%s1028_s3 + $0x58] sm:$0xff]  ;;  %v859_v26 = vld [vmem:[%s1028_s3 + $0x50] sm:$0xff] }
  0x2b   : > { %541 = vmatpush.bf16.msra.mxu1 %v863_v10  ;;  %v869_v19 = vld [vmem:[%s1028_s3 + $0xa0] sm:$0xff]  ;;  %v868_v23 = vld [vmem:[%s1028_s3 + $0x98] sm:$0xff]  ;;  %v867_v27 = vld [vmem:[%s1028_s3 + $0x90] sm:$0xff] }
  0x2c   : > { %555 = vmatpush.bf16.msra.mxu2 %v871_v11  ;;  %v877_v20 = vld [vmem:[%s1028_s3 + $0xe0] sm:$0xff]  ;;  %v876_v24 = vld [vmem:[%s1028_s3 + $0xd8] sm:$0xff]  ;;  %v875_v28 = vld [vmem:[%s1028_s3 + $0xd0] sm:$0xff] }
  0x2d   : > { %569 = vmatpush.bf16.msra.mxu3 %v879_v12  ;;  %v850_v29 = vld [vmem:[%s1028_s3 + $0x8] sm:$0xff]  ;;  %v849_v33 = vld [vmem:[%s1028_s3] sm:$0xff]  ;;  %v847_v38 = vld [vmem:[%s1030_s4 + $0xc] sm:$0xf0] }
  0x2e   : > { %528 = vmatpush.bf16.msra.mxu0 %v854_v13  ;;  %v858_v30 = vld [vmem:[%s1028_s3 + $0x48] sm:$0xff]  ;;  %v857_v34 = vld [vmem:[%s1028_s3 + $0x40] sm:$0xff]  ;;  %v700_v40 = vld [vmem:[%s1030_s4 + $0x10] sm:$0xf0] }
  0x2f   : > { %542 = vmatpush.bf16.msra.mxu1 %v862_v14  ;;  %v866_v31 = vld [vmem:[%s1028_s3 + $0x88] sm:$0xff]  ;;  %v865_v35 = vld [vmem:[%s1028_s3 + $0x80] sm:$0xff]  ;;  %v848_v42 = vld [vmem:[%s1030_s4 + $0x14] sm:$0xf0] }
  0x30   : > { %556 = vmatpush.bf16.msra.mxu2 %v870_v15  ;;  %v874_v32 = vld [vmem:[%s1028_s3 + $0xc8] sm:$0xff]  ;;  %v873_v36 = vld [vmem:[%s1028_s3 + $0xc0] sm:$0xff]  ;;  %v708_v44 = vld [vmem:[%s1030_s4 + $0x18] sm:$0xf0] }
  0x31   : > { %570 = vmatpush.bf16.msra.mxu3 %v878_v16  ;;  %v698_v37 = vld [vmem:[%s1030_s4] sm:$0xf]  ;;  %v845_v39 = vld [vmem:[%s1030_s4 + $0x4] sm:$0xf]  ;;  %v706_v41 = vld [vmem:[%s1030_s4 + $0x8] sm:$0xf] }
  0x32   : > { %529 = vmatpush.bf16.msra.mxu0 %v853_v17  ;;  %v846_v43 = vld [vmem:[%s1030_s4 + $0xc] sm:$0xf]  ;;  %v699_v45 = vor.u32 %v847_v38, %v698_v37  ;;  %v703_v46 = vor.u32 %v845_v39, %v700_v40  ;;  %v707_v47 = vor.u32 %v848_v42, %v706_v41  ;;  %v244_v55 = vld [vmem:[%s1108_s2] sm:$0xff] }
  0x33   : > { %543 = vmatpush.bf16.msra.mxu1 %v861_v18  ;;  %v711_v48 = vor.u32 %v846_v43, %v708_v44  ;;  %v245_v63 = vld [vmem:[%s1108_s2 + $0x8] sm:$0xff] }
  0x34   : > { %557 = vmatpush.bf16.msra.mxu2 %v869_v19 }
  0x35   : > { %571 = vmatpush.bf16.msra.mxu3 %v877_v20 }
  0x36   : > { %530 = vmatpush.bf16.msra.mxu0 %v852_v21 }
  0x37   : > { %544 = vmatpush.bf16.msra.mxu1 %v860_v22 }
  0x38   : > { %558 = vmatpush.bf16.msra.mxu2 %v868_v23 }
  0x39   : > { %572 = vmatpush.bf16.msra.mxu3 %v876_v24 }
  0x3a   : > { %531 = vmatpush.bf16.msra.mxu0 %v851_v25 }
  0x3b   : > { %545 = vmatpush.bf16.msra.mxu1 %v859_v26 }
  0x3c   : > { %559 = vmatpush.bf16.msra.mxu2 %v867_v27 }
  0x3d   : > { %573 = vmatpush.bf16.msra.mxu3 %v875_v28 }
  0x3e   : > { %532 = vmatpush.bf16.msra.mxu0 %v850_v29 }
  0x3f   : > { %546 = vmatpush.bf16.msra.mxu1 %v858_v30 }
  0x40   : > { %560 = vmatpush.bf16.msra.mxu2 %v866_v31 }
  0x41   : > { %574 = vmatpush.bf16.msra.mxu3 %v874_v32 }
  0x42   : > { %533 = vmatpush.bf16.msra.mxu0 %v849_v33 }
  0x43   : > { %547 = vmatpush.bf16.msra.mxu1 %v857_v34 }
  0x44   : > { %561 = vmatpush.bf16.msra.mxu2 %v865_v35 }
  0x45   : > { %575 = vmatpush.bf16.msra.mxu3 %v873_v36  ;;  %534 = vmatmul.bf16.vlgmr.msra.gmra.mxu0 %v699_v45 }
  0x46   : > { %548 = vmatmul.bf16.vlgmr.msra.gmra.mxu1 %v703_v46 }
  0x47   : > { %562 = vmatmul.bf16.vlgmr.msra.gmra.mxu2 %v707_v47 }
  0x48   : > { %576 = vmatmul.bf16.vlgmr.msra.gmra.mxu3 %v711_v48 }
  0xc2   : > { %v535_v49 = vpop.f32.mrf.mxu0 }
  0xc3   : > { %v549_v50 = vpop.f32.mrf.mxu1 }
  0xc4   : > { %v550_v51 = vadd.f32 %v549_v50, %v535_v49 }
  0xca   : > { %v563_v52 = vpop.f32.mrf.mxu2  ;;  %v537_v57 = vpop.f32.mrf.mxu0 }
  0xcb   : > { %v577_v53 = vpop.f32.mrf.mxu3  ;;  %v564_v54 = vadd.f32 %v563_v52, %v550_v51  ;;  %v551_v58 = vpop.f32.mrf.mxu1 }
  0xcc   : > { %v552_v60 = vadd.f32 %v551_v58, %v537_v57 }
  0xcd   : > { %v578_v56 = vadd.f32 %v577_v53, %v564_v54 }
  0xcf   : > { %v582_v59 = vadd.f32 %v578_v56, %v244_v55 }
  0xd1   : > { %584 = vst [vmem:[%s1108_s2] sm:$0xff] %v582_v59 }
  0xd2   : > { %v565_v61 = vpop.f32.mrf.mxu2 }
  0xd3   : > { %v566_v62 = vadd.f32 %v565_v61, %v552_v60  ;;  %v579_v0 = vpop.f32.mrf.mxu3 }
  0xd5   : > { %v580_v1 = vadd.f32 %v579_v0, %v566_v62 }
  0xd7   : > { %v583_v2 = vadd.f32 %v580_v1, %v245_v63 }
  0xd9   : > { %585 = vst [vmem:[%s1108_s2 + $0x8] sm:$0xff] %v583_v2 }
  0xda PF: > { %s12_s13 = sadd.s32 1, %s960_s13   ;;  %s1109_s9 = smov %s948_s10 }
  0xdb   : > { %p9_p11 = scmp.ge.s32.totalorder %s12_s13, 4   ;;  %s1110_s10 = smov %s1013_s17 }
  0xdc   : > { %s1111_s11 = smov %s956_s12  ;;  %s1112_s12 = smov %s1114_s14 }
  0xdd   :  { %11 = sbr.rel (!%p9_p11) target bundleno = 3 (0x3), region = 93 }

</bundles_post_ra>
